<compile_context>
chip_gen: v6e
topology: v6e:2x2x1
jax: 0.10.0
libtpu: 0.0.40
codegen_flags: <defaults>
</compile_context>

<pallas_src>
import functools
import math

import jax
import jax.numpy as jnp
import numpy as np
from jax.experimental import pallas as pl
from jax.experimental.pallas import tpu as pltpu

LANES = 128                      # vreg lane width; all packed vectors are (1, 128)
MXU_DTYPE = jnp.bfloat16         # operand dtype for the per-step MXU matmuls


def _round_up(n, m):
    return ((n + m - 1) // m) * m


# ---------------------------------------------------------------------------
# pltpu.roll direction probe (run once, outside jit)
# ---------------------------------------------------------------------------
_ROLL_LIKE_JNP = None


def _roll_like_jnp():
    """True if pltpu.roll matches jnp.roll (positive shift moves data toward
    higher lane indices).  Probed once on device so the packed-gate lane
    shifts below are correct under either rotate convention."""
    global _ROLL_LIKE_JNP
    if _ROLL_LIKE_JNP is None:
        def probe(x_ref, o_ref):
            o_ref[...] = pltpu.roll(x_ref[...], 1, 1)

        x = jax.lax.broadcasted_iota(jnp.float32, (1, LANES), 1)
        y = pl.pallas_call(
            probe,
            out_shape=jax.ShapeDtypeStruct((1, LANES), jnp.float32),
            in_specs=[pl.BlockSpec(memory_space=pltpu.MemorySpace.VMEM)],
            out_specs=pl.BlockSpec(memory_space=pltpu.MemorySpace.VMEM),
        )(x)
        # jnp.roll convention: out[1] == in[0] == 0.0
        _ROLL_LIKE_JNP = bool(abs(float(y[0, 1])) < 0.5)
    return _ROLL_LIKE_JNP


# ---------------------------------------------------------------------------
# Kernel
# ---------------------------------------------------------------------------
def make_gru_policy_kernel(num_layers, hidden_size, seq_len, shift_rn, shift_zn):
    H = hidden_size
    S = seq_len
    L = num_layers

    def kernel(chunks_ref, *refs):
        # refs = [w_ih_0, w_hh_0, b_bulk_0, b_hn_0, ..., w_out, b_out,
        #         out_ref, gi0_scratch]
        n_w = 4 * L + 2
        w_ih_refs = [refs[4 * l] for l in range(L)]
        w_hh_refs = [refs[4 * l + 1] for l in range(L)]
        b_bulk_refs = [refs[4 * l + 2] for l in range(L)]
        b_hn_refs = [refs[4 * l + 3] for l in range(L)]
        w_out_ref = refs[4 * L]
        b_out_ref = refs[4 * L + 1]
        out_ref = refs[n_w]
        gi0_ref = refs[n_w + 1]   # (S, 128) VMEM scratch: layer-0 input projection

        # Bulk input projection for layer 0: one (S, in)@(in, 128) MXU matmul,
        # off the serial recurrence path (kept in f32 for accuracy).
        gi0_ref[...] = (
            jnp.dot(chunks_ref[...], w_ih_refs[0][...],
                    preferred_element_type=jnp.float32)
            + b_bulk_refs[0][...]
        )

        def gru_step(gi, gh, b_hn_l, h):
            # Packed gate lanes: r @ [0:H), z @ [H:2H), n @ [2H:3H); the hidden
            # state lives on the n lanes so the final combine needs no shift.
            # Lanes >= 3H are zero in gi/gh and bounded garbage in h; they never
            # reach a valid lane because all weight rows/cols outside the valid
            # blocks are zero.
            pre = gi + gh
            sig = jax.nn.sigmoid(pre)                    # r @ [0:H), z @ [H:2H)
            r_n = pltpu.roll(sig, shift_rn, 1)           # r -> [2H:3H)
            n_vec = jnp.tanh(gi + r_n * (gh + b_hn_l))   # n @ [2H:3H)
            z_n = pltpu.roll(sig, shift_zn, 1)           # z -> [2H:3H)
            return n_vec + z_n * (h - n_vec)             # h' = (1-z)*n + z*h

        # Wavefront schedule over (layer, time): wave w runs layer l at time
        # t = w - l.  All layers active within a wave are data-independent so
        # their tiny matmul -> EUP chains overlap.  Layers are visited top-down
        # so layer l reads h[l-1] before layer l-1 overwrites it this wave.
        h = [jnp.zeros((1, LANES), jnp.float32) for _ in range(L)]
        h_mx = [jnp.zeros((1, LANES), MXU_DTYPE) for _ in range(L)]
        for wave in range(S + L - 1):
            for l in range(L - 1, -1, -1):
                t = wave - l
                if t < 0 or t >= S:
                    continue
                if l == 0:
                    gi = gi0_ref[pl.ds(t, 1), :]
                else:
                    gi = (
                        jnp.dot(h_mx[l - 1], w_ih_refs[l][...],
                                preferred_element_type=jnp.float32)
                        + b_bulk_refs[l][...]
                    )
                gh = jnp.dot(h_mx[l], w_hh_refs[l][...],
                             preferred_element_type=jnp.float32)
                h[l] = gru_step(gi, gh, b_hn_refs[l][...], h[l])
                h_mx[l] = h[l].astype(MXU_DTYPE)

        # Output head: hn (L, 128) valid at lanes [2H:3H); w_out rows outside
        # that block are zero, output columns are lane-dense (padded to 128).
        hn = jnp.concatenate(h, axis=0)
        out_ref[...] = jnp.tanh(
            jnp.dot(hn, w_out_ref[...], preferred_element_type=jnp.float32)
            + b_out_ref[...]
        )

    return kernel


# ---------------------------------------------------------------------------
# Wrapper
# ---------------------------------------------------------------------------
def _prep_params(params, input_size, hidden_size, num_layers, output_size):
    """Pack / pad PyTorch-layout GRU + Linear params for the packed-gate kernel."""
    H = hidden_size
    A = 2 * H                                   # lane block where h (and n) live
    OUTP = _round_up(output_size, LANES)

    flat = []
    for l in range(num_layers):
        lp = params["layers"][l]
        w_ih_t = jnp.asarray(lp["w_ih"], jnp.float32).T     # (in_l, 3H), cols r|z|n
        w_hh_t = jnp.asarray(lp["w_hh"], jnp.float32).T     # (H,   3H)
        b_ih = jnp.asarray(lp["b_ih"], jnp.float32)
        b_hh = jnp.asarray(lp["b_hh"], jnp.float32)

        if l == 0:
            # layer-0 input is the raw chunk sequence; bulk matmul stays f32
            w_ih_p = (jnp.zeros((input_size, LANES), jnp.float32)
                      .at[:, :3 * H].set(w_ih_t))
        else:
            # upper-layer input is the previous layer's h (valid lanes [2H:3H))
            w_ih_p = (jnp.zeros((LANES, LANES), jnp.float32)
                      .at[A:A + H, :3 * H].set(w_ih_t)
                      .astype(MXU_DTYPE))
        w_hh_p = (jnp.zeros((LANES, LANES), jnp.float32)
                  .at[A:A + H, :3 * H].set(w_hh_t)
                  .astype(MXU_DTYPE))

        # r/z biases fully pre-summed; n keeps b_hn separate (needed in r*(...))
        b_bulk = jnp.zeros((1, LANES), jnp.float32)
        b_bulk = b_bulk.at[0, 0:H].set(b_ih[0:H] + b_hh[0:H])                 # r
        b_bulk = b_bulk.at[0, H:2 * H].set(b_ih[H:2 * H] + b_hh[H:2 * H])     # z
        b_bulk = b_bulk.at[0, 2 * H:3 * H].set(b_ih[2 * H:3 * H])             # n: b_in
        b_hn = (jnp.zeros((1, LANES), jnp.float32)
                .at[0, 2 * H:3 * H].set(b_hh[2 * H:3 * H]))

        flat += [w_ih_p, w_hh_p, b_bulk, b_hn]

    w_out_p = (jnp.zeros((LANES, OUTP), jnp.float32)
               .at[A:A + H, :output_size]
               .set(jnp.asarray(params["w_out"], jnp.float32).T))
    b_out_p = (jnp.zeros((1, OUTP), jnp.float32)
               .at[0, :output_size].set(jnp.asarray(params["b_out"], jnp.float32)))
    flat += [w_out_p, b_out_p]
    return flat, OUTP


@functools.partial(jax.jit, static_argnames=("input_size", "hidden_size",
                                             "num_layers", "output_size",
                                             "roll_like_jnp"))
def _gru_policy_forward(x, params, *, input_size, hidden_size, num_layers,
                        output_size, roll_like_jnp):
    H = hidden_size
    seq_len = x.shape[0] // input_size
    if seq_len == 0:
        raise ValueError("observation vector shorter than input_size: "
                         "no chunks to feed the GRU")
    if 3 * H > LANES:
        # TODO(synk): per-gate 128-lane-padded fallback for 3*hidden_size > 128.
        raise NotImplementedError("packed-gate kernel requires 3*hidden_size <= 128")

    chunks = (x[: seq_len * input_size]
              .reshape(seq_len, input_size).astype(jnp.float32))
    flat, OUTP = _prep_params(params, input_size, hidden_size, num_layers,
                              output_size)

    # lane shifts (move lane i -> i + k), resolved for the probed roll convention
    shift_rn = (2 * H) if roll_like_jnp else (LANES - 2 * H)
    shift_zn = H if roll_like_jnp else (LANES - H)

    kernel = make_gru_policy_kernel(num_layers, H, seq_len, shift_rn, shift_zn)

    vmem = pl.BlockSpec(memory_space=pltpu.MemorySpace.VMEM)
    out_pad = pl.pallas_call(
        kernel,
        out_shape=jax.ShapeDtypeStruct((num_layers, OUTP), jnp.float32),
        in_specs=[vmem] * (1 + len(flat)),
        out_specs=vmem,
        scratch_shapes=[
            pltpu.VMEM((seq_len, LANES), jnp.float32),   # bulk gi for layer 0
        ],
    )(chunks, *flat)
    return out_pad[:, :output_size]


def gru_policy_forward(x, params, *, input_size, hidden_size, num_layers,
                       output_size):
    return _gru_policy_forward(
        x, params, input_size=input_size, hidden_size=hidden_size,
        num_layers=num_layers, output_size=output_size,
        roll_like_jnp=_roll_like_jnp())


# ---------------------------------------------------------------------------
# Params init + pure-JAX reference (mirrors torch.nn.GRU + Linear + tanh)
# ---------------------------------------------------------------------------
def init_params(key, input_size, hidden_size, num_layers, output_size):
    """Deterministic init mimicking PyTorch's U(-1/sqrt(H), 1/sqrt(H))."""
    bound = 1.0 / math.sqrt(hidden_size)

    def u(k, shape):
        return jax.random.uniform(k, shape, jnp.float32, -bound, bound)

    params = {"layers": []}
    for l in range(num_layers):
        in_l = input_size if l == 0 else hidden_size
        key, k1, k2, k3, k4 = jax.random.split(key, 5)
        params["layers"].append({
            "w_ih": u(k1, (3 * hidden_size, in_l)),
            "w_hh": u(k2, (3 * hidden_size, hidden_size)),
            "b_ih": u(k3, (3 * hidden_size,)),
            "b_hh": u(k4, (3 * hidden_size,)),
        })
    key, k1, k2 = jax.random.split(key, 3)
    params["w_out"] = u(k1, (output_size, hidden_size))
    params["b_out"] = u(k2, (output_size,))
    return params


def gru_policy_reference(x, params, *, input_size, hidden_size, num_layers,
                         output_size):
    H = hidden_size
    seq_len = x.shape[0] // input_size
    chunks = x[: seq_len * input_size].reshape(seq_len, input_size)
    hs = [jnp.zeros((H,), jnp.float32) for _ in range(num_layers)]
    for t in range(seq_len):
        inp = chunks[t]
        for l in range(num_layers):
            lp = params["layers"][l]
            gi = lp["w_ih"] @ inp + lp["b_ih"]
            gh = lp["w_hh"] @ hs[l] + lp["b_hh"]
            r = jax.nn.sigmoid(gi[0:H] + gh[0:H])
            z = jax.nn.sigmoid(gi[H:2 * H] + gh[H:2 * H])
            n = jnp.tanh(gi[2 * H:3 * H] + r * gh[2 * H:3 * H])
            hs[l] = (1.0 - z) * n + z * hs[l]
            inp = hs[l]
    hn = jnp.stack(hs, axis=0)
    return jnp.tanh(hn @ params["w_out"].T + params["b_out"])


if __name__ == "__main__":
    input_size = 8
    hidden_size = 32
    hidden_layers = 2
    output_size = 4
    seq = 8

    key = jax.random.PRNGKey(0)
    kx, kp = jax.random.split(key)
    # flat observation vector; 3 trailing elements exercise chunk truncation
    x = jax.random.normal(kx, (seq * input_size + 3,), jnp.float32)
    params = init_params(kp, input_size, hidden_size, hidden_layers, output_size)

    out = gru_policy_forward(
        x, params,
        input_size=input_size, hidden_size=hidden_size,
        num_layers=hidden_layers, output_size=output_size,
    )
    out = jax.block_until_ready(out)

    ref = gru_policy_reference(
        x, params,
        input_size=input_size, hidden_size=hidden_size,
        num_layers=hidden_layers, output_size=output_size,
    )
    # Tolerance covers bf16 MXU operands in the recurrent / cross-layer matmuls
    # vs the f32 reference (the original module is f64; typical |err| ~ 5e-3).
    np.testing.assert_allclose(np.asarray(out), np.asarray(ref),
                               rtol=0.0, atol=2.5e-2)

    print("KERNEL_OK")
</pallas_src>

<mosaic_0001>
module attributes {stable_mosaic.version = 11 : i64} {
  func.func @probe(%arg0: memref<1x128xf32, #tpu.memory_space<vmem>>, %arg1: memref<1x128xf32, #tpu.memory_space<vmem>>) attributes {dimension_semantics = [], scalar_prefetch = 0 : i64, scratch_operands = 0 : i64, tpu.core_type = #tpu.core_type<tc>} {
    %c0 = arith.constant 0 : index
    %c0_0 = arith.constant 0 : index
    %0 = vector.load %arg0[%c0, %c0_0] : memref<1x128xf32, #tpu.memory_space<vmem>>, vector<1x128xf32>
    %c1_i32 = arith.constant 1 : i32
    %1 = tpu.dynamic_rotate %0 by %c1_i32 dim 1 : vector<1x128xf32>, i32 -> vector<1x128xf32>
    %c0_1 = arith.constant 0 : index
    %c0_2 = arith.constant 0 : index
    %2 = vector.load %arg1[%c0_1, %c0_2] : memref<1x128xf32, #tpu.memory_space<vmem>>, vector<1x128xf32>
    tpu.vector_store %arg1[%c0_1, %c0_2], %1 {strides = array<i32>} : memref<1x128xf32, #tpu.memory_space<vmem>>, vector<1x128xf32>,
    return
  }
}

</mosaic_0001>

<bundles_post_ra>
// kernel: tpu_custom_call.1
= control target key start
LH: loop header
LB: loop body
LE: loop exit
PB: predicated region body
PF: predicated region fallthrough
CT: control target
= control target key end

     0   :  { %6 = vsyncpa [#allocation3], 0  ;;  %s106_s0 = inlined_call_operand.hbm [shape: f32[1,128], index: 0, kind: input, shape index: {}]   ;;  %s107_s1 = inlined_call_operand.hbm [shape: f32[1,128], index: 1, kind: output, shape index: {}]  }
   0x1   :  { %7 = vsyncpa [#allocation4], 0  ;;  %s87_s6 = smov [#allocation2]  }
   0x2   :  { %s14_s7 = sshll.u32 %s87_s6, 4  ;;  %s15_s7 = int_to_ptr.vmem [resolvable:$true] %s14_s7 }
   0x3   :  { %s51_s8 = scalar_lea.vmem %s15_s7, 16  ;;  %s55_s9 = scalar_lea.vmem %s15_s7, 32 }
   0x4   :  { %p52_p0 = scmp.ne.s32.totalorder %s15_s7, %s51_s8  ;;  %p56_p1 = scmp.lt.s32.totalorder %s15_s7, %s15_s7 }
   0x5   :  { %p57_p2 = scmp.lt.s32.totalorder %s55_s9, %s51_s8 }
   0x7   :  { %p58_p3 = por %p57_p2, %p56_p1 }
   0x9   :  { %p59_p4 = pnand %p58_p3, %p52_p0 }
   0xb   :  { %62 = shalt.err (!%p59_p4)
}
   0xc   :  { %17 = dma.hbm_to_vmem [thread:$0]  %s106_s0, 16, %s15_s7, [#allocation3]  }
   0xd   :  { %83 = dma.done.wait [#allocation3], 16  }
   0xe   :  { %84 = vsyncadd [#allocation3], 4294967280  ;;  %v21_v0 = vld [vmem:[#allocation2] sm:$0x1]  ;;  %s88_s12 = smov 1   ;;  %s89_s13 = smov [#allocation5]  }
   0xf   :  { %22 = vrot.lane.b32.xlu0 %v21_v0, %s88_s12  ;;  %s31_s14 = sshll.u32 %s89_s13, 4  ;;  %s32_s14 = int_to_ptr.vmem [resolvable:$true] %s31_s14 }
  0x10   :  { %s63_s15 = scalar_lea.vmem %s32_s14, 16  ;;  %s67_s16 = scalar_lea.vmem %s32_s14, 32 }
  0x11   :  { %p64_p5 = scmp.ne.s32.totalorder %s32_s14, %s63_s15  ;;  %p68_p6 = scmp.lt.s32.totalorder %s32_s14, %s32_s14 }
  0x12   :  { %p69_p7 = scmp.lt.s32.totalorder %s67_s16, %s63_s15 }
  0x14   :  { %p70_p8 = por %p69_p7, %p68_p6 }
  0x16   :  { %p71_p9 = pnand %p70_p8, %p64_p5 }
  0x81   :  { %v23_v1 = vpop.permute.xlu0 %22 }
  0x82   :  { %24 = vst [vmem:[#allocation5] sm:$0x1] %v23_v1 }
  0x83   :  { %74 = shalt.err (!%p71_p9)
}
  0x84   :  { %34 = dma.vmem_to_hbm [thread:$0]  %s32_s14, 16, %s107_s1, [#allocation4]  }
  0x85   :  { %85 = dma.done.wait [#allocation4], 16  }
  0x86   :  { %86 = vsyncadd [#allocation4], 4294967280 }
  0x87   :  { %38 = vsyncpa [#allocation3], 1 }
  0x88   :  { %39 = vsyncpa [#allocation4], 1 }

</bundles_post_ra>
